<compile_context>
chip_gen: v6e
topology: v6e:2x2x1
jax: 0.10.0
libtpu: 0.0.40
codegen_flags: <defaults>
</compile_context>

<pallas_src>
import functools
import math

import jax
import jax.numpy as jnp
from jax.experimental import pallas as pl
from jax.experimental.pallas import tpu as pltpu


# ----------------------------------------------------------------------------
# SEBlock
# ----------------------------------------------------------------------------
def se_block_kernel(a_ref, x_ref, w1_ref, w2_ref, o_ref):
    # a_ref:  (1,)          SMEM  PReLU slope
    # x_ref:  (Bt, C, HW)   VMEM  NCHW-native (spatial on lanes)
    # w1_ref: (C, Ch)       VMEM  torch W1.T, pre-scaled by 1/HW
    # w2_ref: (Ch, C)       VMEM  torch W2.T
    # o_ref:  (Bt, C, HW)   VMEM
    a = a_ref[0]

    # Squeeze: sum over the spatial (lane) axis, accumulated in f32.
    # The 1/HW of the mean is folded into w1, so this is a plain sum.
    y = jnp.sum(x_ref[...], axis=2, dtype=jnp.float32)                  # (Bt, C)

    # Excitation MLP (tiny; hidden under the DMA of neighbouring blocks).
    h = jnp.dot(y, w1_ref[...], preferred_element_type=jnp.float32)     # (Bt, Ch)
    h = jnp.maximum(h, 0.0) + a * jnp.minimum(h, 0.0)                   # PReLU
    s = jax.nn.sigmoid(
        jnp.dot(h, w2_ref[...], preferred_element_type=jnp.float32))    # (Bt, C)

    # Scale: re-read x from VMEM (block is not kept live in vregs across the
    # MLP) and do a single fused multiply + wide store over the spatial lanes.
    scale = s.astype(o_ref.dtype)[:, :, None]                           # (Bt, C, 1)
    o_ref[...] = (x_ref[...] * scale).astype(o_ref.dtype)


def se_block(x, w1, w2, prelu_a, *, block_bytes_target=4 * 1024 * 1024):
    """SEBlock forward.

    x:  (B, C, H, W)  activations (f32 or bf16)
    w1: (C//r, C)     torch-style Linear weight (out, in), no bias
    w2: (C, C//r)     torch-style Linear weight (out, in), no bias
    prelu_a: scalar PReLU slope
    """
    B, C, H, W = x.shape
    HW = H * W
    Ch = w1.shape[0]
    itemsize = jnp.dtype(x.dtype).itemsize

    # NCHW-native: collapsing the two trailing contiguous dims is free.
    x_r = x.reshape(B, C, HW)

    # Torch Linear computes y @ W.T; fold the 1/HW of the mean into W1.
    w1_t = jnp.transpose(w1).astype(jnp.float32) * (1.0 / float(HW))    # (C, Ch)
    w2_t = jnp.transpose(w2).astype(jnp.float32)                        # (Ch, C)
    a = jnp.asarray(prelu_a, jnp.float32).reshape((1,))

    # Batch-block size: aim for ~block_bytes_target per x block so the grid is
    # double-buffered and VMEM use stays well under v7x's 64 MiB.
    per_sample = HW * C * itemsize
    bt = int(max(1, min(B, block_bytes_target // max(per_sample, 1))))
    grid = (pl.cdiv(B, bt),)

    block_bytes = bt * per_sample
    weight_bytes = (w1_t.size + w2_t.size) * 4
    vmem_limit = int(min(48 * 2**20,
                         max(16 * 2**20,
                             4 * block_bytes + 2 * weight_bytes + (2 << 20))))

    cost = pl.CostEstimate(
        flops=int(2 * B * HW * C + 4 * B * C * Ch),
        transcendentals=int(B * C),
        bytes_accessed=int(2 * B * HW * C * itemsize + weight_bytes),
    )

    out_r = pl.pallas_call(
        se_block_kernel,
        out_shape=jax.ShapeDtypeStruct((B, C, HW), x.dtype),
        grid=grid,
        in_specs=[
            pl.BlockSpec(memory_space=pltpu.MemorySpace.SMEM),           # PReLU slope
            pl.BlockSpec((bt, C, HW), lambda b: (b, 0, 0)),              # x block
            pl.BlockSpec(w1_t.shape, lambda b: (0, 0)),                  # W1 (resident)
            pl.BlockSpec(w2_t.shape, lambda b: (0, 0)),                  # W2 (resident)
        ],
        out_specs=pl.BlockSpec((bt, C, HW), lambda b: (b, 0, 0)),
        compiler_params=pltpu.CompilerParams(
            dimension_semantics=("parallel",),
            vmem_limit_bytes=vmem_limit,
        ),
        cost_estimate=cost,
    )(a, x_r, w1_t, w2_t)

    return out_r.reshape(B, C, H, W)


def se_block_reference(x, w1, w2, prelu_a):
    y = jnp.mean(x, axis=(2, 3))                                        # (B, C)
    h = y @ w1.T                                                        # (B, C//r)
    h = jnp.maximum(h, 0.0) + prelu_a * jnp.minimum(h, 0.0)
    s = jax.nn.sigmoid(h @ w2.T)                                        # (B, C)
    return x * s[:, :, None, None]


# ----------------------------------------------------------------------------
# ArcMarginProduct head
# ----------------------------------------------------------------------------
def arc_margin_kernel(x_ref, w_ref, lbl_ref, o_ref, *, s, cos_m, sin_m):
    # x_ref:   (Bt, D)   raw (un-normalized) embeddings
    # w_ref:   (D, Nt)   pre-normalized class weights, transposed (lane-dense N)
    # lbl_ref: (Bt, 1)   int32 labels
    # o_ref:   (Bt, Nt)  f32 logits
    x = x_ref[...].astype(jnp.float32)

    # F.normalize(input): x / max(||x||_2, 1e-12), fused per block.
    ssq = jnp.sum(x * x, axis=1, keepdims=True)                          # (Bt, 1)
    inv = 1.0 / jnp.maximum(jnp.sqrt(ssq), 1e-12)
    xn = x * inv

    cos = jnp.dot(xn, w_ref[...], preferred_element_type=jnp.float32)    # (Bt, Nt)
    cos = jnp.clip(cos, -1.0 + 1e-5, 1.0 - 1e-5)
    phi = cos * cos_m - jnp.sqrt(1.0 - cos * cos + 1e-7) * sin_m

    # one_hot(label) restricted to this class tile.
    nt = o_ref.shape[1]
    col = jax.lax.broadcasted_iota(jnp.int32, o_ref.shape, 1) + pl.program_id(1) * nt
    one_hot = col == lbl_ref[...]

    o_ref[...] = (jnp.where(one_hot, phi, cos) * s).astype(o_ref.dtype)


def arc_margin(x, weight, labels, *, s=64.0, m=0.5, bt_max=128, nt_max=512):
    """ArcMarginProduct forward.

    x:      (B, D)   embeddings (pre-normalization)
    weight: (N, D)   class weights (torch layout: out, in)
    labels: (B,)     int class indices
    """
    B, D = x.shape
    N = weight.shape[0]

    # Normalize class-weight rows once per call (parameter, not activation),
    # and present them lane-dense over classes.
    wf = weight.astype(jnp.float32)
    wn = wf / jnp.maximum(jnp.linalg.norm(wf, axis=1, keepdims=True), 1e-12)
    w_t = jnp.transpose(wn)                                              # (D, N)
    lbl = labels.astype(jnp.int32).reshape(B, 1)

    bt = B if B <= bt_max else bt_max
    nt = N if N <= nt_max else nt_max
    grid = (pl.cdiv(B, bt), pl.cdiv(N, nt))

    kernel = functools.partial(arc_margin_kernel,
                               s=float(s), cos_m=math.cos(m), sin_m=math.sin(m))

    cost = pl.CostEstimate(
        flops=int(2 * B * D * N + 8 * B * N + 3 * B * D),
        transcendentals=int(B * N + B),
        bytes_accessed=int((B * D + D * N + B * N + B) * 4),
    )
    vmem_limit = int(min(48 * 2**20,
                         max(16 * 2**20, 4 * (bt * D + D * nt + bt * nt) * 4 + (1 << 20))))

    return pl.pallas_call(
        kernel,
        out_shape=jax.ShapeDtypeStruct((B, N), jnp.float32),
        grid=grid,
        in_specs=[
            pl.BlockSpec((bt, D), lambda i, j: (i, 0)),                  # embeddings
            pl.BlockSpec((D, nt), lambda i, j: (0, j)),                  # class weights
            pl.BlockSpec((bt, 1), lambda i, j: (i, 0)),                  # labels
        ],
        out_specs=pl.BlockSpec((bt, nt), lambda i, j: (i, j)),
        compiler_params=pltpu.CompilerParams(
            dimension_semantics=("parallel", "parallel"),
            vmem_limit_bytes=vmem_limit,
        ),
        cost_estimate=cost,
    )(x, w_t, lbl)


def arc_margin_reference(x, weight, labels, s=64.0, m=0.5):
    xn = x / jnp.maximum(jnp.linalg.norm(x, axis=1, keepdims=True), 1e-12)
    wn = weight / jnp.maximum(jnp.linalg.norm(weight, axis=1, keepdims=True), 1e-12)
    cos = jnp.clip(xn @ wn.T, -1.0 + 1e-5, 1.0 - 1e-5)
    phi = cos * math.cos(m) - jnp.sqrt(1.0 - cos * cos + 1e-7) * math.sin(m)
    one_hot = (jnp.arange(weight.shape[0])[None, :] == labels[:, None]).astype(cos.dtype)
    return (one_hot * phi + (1.0 - one_hot) * cos) * s


# ----------------------------------------------------------------------------
# Demo / self-test
# ----------------------------------------------------------------------------
if __name__ == "__main__":
    key = jax.random.PRNGKey(0)

    # --- SEBlock: shapes consistent with SEBlock(channels=32, reduction=16) ---
    B, C, H, W = 4, 32, 8, 8
    reduction = 16
    Ch = C // reduction

    kx, k1, k2, ke, kw, kl = jax.random.split(key, 6)
    x = jax.random.normal(kx, (B, C, H, W), dtype=jnp.float32)
    w1 = jax.random.normal(k1, (Ch, C), dtype=jnp.float32) * (1.0 / jnp.sqrt(C))
    w2 = jax.random.normal(k2, (C, Ch), dtype=jnp.float32) * (1.0 / jnp.sqrt(Ch))
    prelu_a = 0.25  # nn.PReLU() default init

    se_ref = se_block_reference(x, w1, w2, prelu_a)

    # Small block target so the demo exercises a multi-step, pipelined grid
    # (bt=2 -> grid=(2,)); production shapes use the ~4 MiB default.
    se_out = se_block(x, w1, w2, prelu_a, block_bytes_target=2 * H * W * C * 4)
    se_out = jax.block_until_ready(se_out)
    assert se_out.shape == (B, C, H, W)
    assert jnp.allclose(se_out, se_ref, atol=1e-4, rtol=1e-4), "SEBlock f32 mismatch"

    # bf16 activations (the mem-bound case the kernel is tuned for).
    se_out_bf16 = se_block(x.astype(jnp.bfloat16), w1, w2, prelu_a,
                           block_bytes_target=2 * H * W * C * 2)
    se_out_bf16 = jax.block_until_ready(se_out_bf16)
    assert se_out_bf16.dtype == jnp.bfloat16
    assert jnp.allclose(se_out_bf16.astype(jnp.float32), se_ref, atol=1e-1, rtol=1e-1), \
        "SEBlock bf16 mismatch"

    # --- ArcMarginProduct head: embedding dim 512 (as in ArcFaceModel) ---
    Bm, D, num_classes = 8, 512, 1000
    emb = jax.random.normal(ke, (Bm, D), dtype=jnp.float32)
    cls_w = jax.random.normal(kw, (num_classes, D), dtype=jnp.float32) * (1.0 / jnp.sqrt(D))
    labels = jax.random.randint(kl, (Bm,), 0, num_classes)

    arc_ref = arc_margin_reference(emb, cls_w, labels, s=64.0, m=0.5)
    arc_out = arc_margin(emb, cls_w, labels, s=64.0, m=0.5)
    arc_out = jax.block_until_ready(arc_out)
    assert arc_out.shape == (Bm, num_classes)
    assert jnp.allclose(arc_out, arc_ref, atol=2e-3, rtol=1e-3), "ArcMargin mismatch"

    print("KERNEL_OK")
</pallas_src>

<mosaic_0001>
module attributes {stable_mosaic.version = 11 : i64} {
  func.func @se_block_kernel(%arg0: i32, %arg1: memref<1xf32, #tpu.memory_space<smem>>, %arg2: memref<2x32x64xf32, #tpu.memory_space<vmem>>, %arg3: memref<32x2xf32, #tpu.memory_space<vmem>>, %arg4: memref<2x32xf32, #tpu.memory_space<vmem>>, %arg5: memref<2x32x64xf32, #tpu.memory_space<vmem>>) attributes {dimension_semantics = [#tpu.dimension_semantics<parallel>], iteration_bounds = array<i64: 2>, scalar_prefetch = 0 : i64, scratch_operands = 0 : i64, tpu.core_type = #tpu.core_type<tc>, window_params = [{transform_indices = @transform_0, window_bounds = array<i64: 1>}, {transform_indices = @transform_1, window_bounds = array<i64: 2, 32, 64>}, {pipeline_mode = #tpu.pipeline_mode<synchronous>, transform_indices = @transform_2, window_bounds = array<i64: 32, 2>}, {pipeline_mode = #tpu.pipeline_mode<synchronous>, transform_indices = @transform_3, window_bounds = array<i64: 2, 32>}, {transform_indices = @transform_4, window_bounds = array<i64: 2, 32, 64>}]} {
    %c0 = arith.constant 0 : index
    %0 = memref.load %arg1[%c0] : memref<1xf32, #tpu.memory_space<smem>>
    %c0_0 = arith.constant 0 : index
    %c0_1 = arith.constant 0 : index
    %c0_2 = arith.constant 0 : index
    %1 = vector.load %arg2[%c0_0, %c0_1, %c0_2] : memref<2x32x64xf32, #tpu.memory_space<vmem>>, vector<2x32x64xf32>
    %cst = arith.constant dense<0.000000e+00> : vector<2x32xf32>
    %2 = vector.multi_reduction <add>, %1, %cst [2] : vector<2x32x64xf32> to vector<2x32xf32>
    %c0_3 = arith.constant 0 : index
    %c0_4 = arith.constant 0 : index
    %3 = vector.load %arg3[%c0_3, %c0_4] : memref<32x2xf32, #tpu.memory_space<vmem>>, vector<32x2xf32>
    %cst_5 = arith.constant dense<0.000000e+00> : vector<2x2xf32>
    %4 = tpu.matmul %2, %3, %cst_5 {dimension_numbers = #tpu.dot_dimension_numbers<[1], [0], [0], [1], [0, 0, 1, 1], [], []>} : vector<2x32xf32>, vector<32x2xf32>, vector<2x2xf32> -> vector<2x2xf32>
    %cst_6 = arith.constant 0.000000e+00 : f32
    %5 = vector.broadcast %cst_6 : f32 to vector<2x2xf32>
    %6 = arith.maximumf %4, %5 : vector<2x2xf32>
    %cst_7 = arith.constant 0.000000e+00 : f32
    %7 = vector.broadcast %cst_7 : f32 to vector<2x2xf32>
    %8 = arith.minimumf %4, %7 : vector<2x2xf32>
    %9 = vector.broadcast %0 : f32 to vector<2x2xf32>
    %10 = arith.mulf %9, %8 : vector<2x2xf32>
    %11 = arith.addf %6, %10 : vector<2x2xf32>
    %c0_8 = arith.constant 0 : index
    %c0_9 = arith.constant 0 : index
    %12 = vector.load %arg4[%c0_8, %c0_9] : memref<2x32xf32, #tpu.memory_space<vmem>>, vector<2x32xf32>
    %cst_10 = arith.constant dense<0.000000e+00> : vector<2x32xf32>
    %13 = tpu.matmul %11, %12, %cst_10 {dimension_numbers = #tpu.dot_dimension_numbers<[1], [0], [0], [1], [0, 0, 1, 1], [], []>} : vector<2x2xf32>, vector<2x32xf32>, vector<2x32xf32> -> vector<2x32xf32>
    %14 = arith.negf %13 : vector<2x32xf32>
    %15 = math.exp %14 : vector<2x32xf32>
    %cst_11 = arith.constant 1.000000e+00 : f32
    %16 = vector.broadcast %cst_11 : f32 to vector<2x32xf32>
    %17 = arith.addf %16, %15 : vector<2x32xf32>
    %18 = arith.divf %16, %17 : vector<2x32xf32>
    %19 = vector.shape_cast %18 : vector<2x32xf32> to vector<2x32x1xf32>
    %c0_12 = arith.constant 0 : index
    %c0_13 = arith.constant 0 : index
    %c0_14 = arith.constant 0 : index
    %20 = vector.load %arg2[%c0_12, %c0_13, %c0_14] : memref<2x32x64xf32, #tpu.memory_space<vmem>>, vector<2x32x64xf32>
    %21 = vector.broadcast %19 : vector<2x32x1xf32> to vector<2x32x64xf32>
    %22 = arith.mulf %20, %21 : vector<2x32x64xf32>
    %c0_15 = arith.constant 0 : index
    %c0_16 = arith.constant 0 : index
    %c0_17 = arith.constant 0 : index
    %23 = vector.load %arg5[%c0_15, %c0_16, %c0_17] : memref<2x32x64xf32, #tpu.memory_space<vmem>>, vector<2x32x64xf32>
    tpu.vector_store %arg5[%c0_15, %c0_16, %c0_17], %22 {strides = array<i32>} : memref<2x32x64xf32, #tpu.memory_space<vmem>>, vector<2x32x64xf32>,
    return
  }
  func.func @transform_0(%arg0: i32) -> i32 {
    %c0_i32 = arith.constant 0 : i32
    %c0_i32_0 = arith.constant 0 : i32
    return %c0_i32 : i32
  }
  func.func @transform_1(%arg0: i32) -> (i32, i32, i32) {
    %c0_i32 = arith.constant 0 : i32
    %c0_i32_0 = arith.constant 0 : i32
    %c0_i32_1 = arith.constant 0 : i32
    return %arg0, %c0_i32, %c0_i32_0 : i32, i32, i32
  }
  func.func @transform_2(%arg0: i32) -> (i32, i32) {
    %c0_i32 = arith.constant 0 : i32
    %c0_i32_0 = arith.constant 0 : i32
    %c0_i32_1 = arith.constant 0 : i32
    return %c0_i32, %c0_i32_0 : i32, i32
  }
  func.func @transform_3(%arg0: i32) -> (i32, i32) {
    %c0_i32 = arith.constant 0 : i32
    %c0_i32_0 = arith.constant 0 : i32
    %c0_i32_1 = arith.constant 0 : i32
    return %c0_i32, %c0_i32_0 : i32, i32
  }
  func.func @transform_4(%arg0: i32) -> (i32, i32, i32) {
    %c0_i32 = arith.constant 0 : i32
    %c0_i32_0 = arith.constant 0 : i32
    %c0_i32_1 = arith.constant 0 : i32
    return %arg0, %c0_i32, %c0_i32_0 : i32, i32, i32
  }
}

</mosaic_0001>

<bundles_post_ra>
// kernel: tpu_custom_call.1
= control target key start
LH: loop header
LB: loop body
LE: loop exit
PB: predicated region body
PF: predicated region fallthrough
CT: control target
= control target key end

     0   :  { %s1073_s0 = inlined_call_operand.<no memory space> [shape: f32[1], index: 0, kind: input, shape index: {}]   ;;  %s1074_s1 = inlined_call_operand.hbm [shape: f32[4,32,64], index: 1, kind: input, shape index: {}]   ;;  %s1075_s2 = inlined_call_operand.vmem [shape: f32[32,2], index: 2, kind: input, shape index: {}]   ;;  %s1076_s3 = inlined_call_operand.vmem [shape: f32[2,32], index: 3, kind: input, shape index: {}]   ;;  %s1077_s4 = inlined_call_operand.hbm [shape: f32[4,32,64], index: 4, kind: output, shape index: {}]  }
   0x1   :  { %9 = sst [smem:[#allocation2]] %s1073_s0 }
   0x2   :  { %10 = vsyncpa [#allocation4], 0 }
   0x3   :  { %12 = vsyncpa [#allocation4 + $0x1], 0 }
   0x4   :  { %13 = vsyncpa [#allocation5], 0 }
   0x5   :  { %15 = vsyncpa [#allocation5 + $0x1], 0  ;;  %s852_s17 = smov 0   ;;  %s854_s18 = smov 0  }
   0x6   :  { %s856_s19 = smov 0   ;;  %s858_s20 = smov 0  }
   0x7 LB: > { %s873_s0 = sadd.s32 4294967295, %s814_s20   ;;  %s619_s21 = sadd.s32 4294967294, %s814_s20   ;;  %s814_s20 = sphi %s858_s20, %s1092_s20   ;;  %s810_s19 = sphi %s856_s19, %s1091_s19   ;;  %s806_s18 = sphi %s854_s18, %s1090_s18   ;;  %s802_s17 = sphi %s852_s17, %s1089_s17  }
   0x8   : > { %s877_s22 = sadd.s32 1, %s814_s20   ;;  %s49_s23 = sadd.s32 1, %s810_s19 }
   0x9   : > { %s46_s24 = ssub.s32 %s814_s20, %s877_s22  ;;  %p56_p0 = scmp.ne.s32.totalorder %s810_s19, %s806_s18 }
   0xa   : > { %p47_p1 = scmp.eq.s32.totalorder %s46_s24, 0  ;;  %p57_p2 = scmp.eq.s32.totalorder %s814_s20, 0 }
   0xb   : > { %p62_p3 = scmp.ne.s32.totalorder %s806_s18, %s802_s17  ;;  %p63_p4 = scmp.eq.s32.totalorder %s873_s0, 0 }
   0xc   : > { %s889_s25 = scalar_select %p47_p1, %s810_s19, %s49_s23  }
   0xd   : > { %p891_p5 = por %p57_p2, %p56_p0  ;;  %p895_p6 = por %p63_p4, %p62_p3 }
   0xe   : > { %p128_p7 = scmp.eq.s32.totalorder %s873_s0, 1  ;;  %p134_p8 = scmp.eq.s32.totalorder %s619_s21, 1 }
   0xf   : > { %s1081_s27 = scalar_select %p895_p6, 1, 0 }
  0x10   : > { %p678_p10 = scmp.lt.s32.totalorder %s814_s20, 2  ;;  %p902_p11 = por %p128_p7, %p56_p0 }
  0x11   : > { %p906_p12 = por %p134_p8, %p62_p3  ;;  %s163_s30 = sand.u32 1, %s810_s19  }
  0x12   : > { %s1082_s28 = scalar_select %p902_p11, 1, 0 }
  0x13   : > { %s1083_s29 = scalar_select %p906_p12, 1, 0 }
  0x14   : > { %s640_s5 = sshll.u32 %s814_s20, 10  ;;  %s622_s6 = sshll.u32 %s163_s30, 6 }
  0x15   : > { %s915_s9 = scalar_lea.hbm %s1074_s1, %s640_s5  ;;  %s167_s10 = scalar_lea.vmem [#allocation3], %s622_s6 }
  0x16   : > { %s175_s11 = sshll.u32 %s167_s10, 4  ;;  %p919_p13 = pnand %p678_p10, %p891_p5  ;;  %s923_s11 = int_to_ptr.vmem [resolvable:$true] %s175_s11 }
  0x17   : > { %s925_s13 = scalar_lea.sflag [#allocation4], %s163_s30  ;;  %s722_s14 = scalar_lea.hbm %s915_s9, 1024 }
  0x18   : > { %p723_p0 = scmp.ne.s32.totalorder %s915_s9, %s722_s14  ;;  %p724_p1 = pneg %p919_p13 }
  0x19   : > { %s727_s21 = scalar_lea.hbm %s1074_s1, 2048  ;;  %p728_p4 = scmp.lt.s32.totalorder %s915_s9, %s1074_s1 }
  0x1a   : > { %p725_p2 = pnand %p724_p1, %p723_p0  ;;  %p729_p5 = scmp.lt.s32.totalorder %s727_s21, %s722_s14 }
  0x1c   : > { %p726_p3 = pneg %p725_p2  ;;  %p730_p7 = por %p729_p5, %p728_p4 }
  0x1e   : > { %p731_p8 = pnand %p730_p7, %p726_p3 }
  0x20   : > { %734 = shalt.err (!%p731_p8)
}
  0x21   : > { %s735_s26 = scalar_lea.vmem %s923_s11, 1024  ;;  %s816_s30 = smov [#allocation3]  }
  0x22   : > { %p736_p10 = scmp.ne.s32.totalorder %s923_s11, %s735_s26  ;;  %s740_s5 = sshll.u32 %s816_s30, 4  ;;  %s741_s5 = int_to_ptr.vmem [resolvable:$false] %s740_s5 }
  0x23   : > { %s742_s6 = scalar_lea.vmem %s741_s5, 2048  ;;  %p743_p2 = scmp.lt.s32.totalorder %s923_s11, %s741_s5 }
  0x24   : > { %p738_p9 = pnand %p736_p10, %p724_p1  ;;  %p744_p12 = scmp.lt.s32.totalorder %s742_s6, %s735_s26 }
  0x26   : > { %p739_p0 = pneg %p738_p9  ;;  %p745_p11 = por %p744_p12, %p743_p2 }
  0x28   : > { %p746_p6 = pnand %p745_p11, %p739_p0 }
  0x2a   : > { %749 = shalt.err (!%p746_p6)
}
  0x2b   : > { %s817_s7 = smov 128   ;;  %s818_s8 = smov 8  }
  0x2c   : > { %673 = dma.hbm_to_vmem [thread:$0]  (!%p919_p13), %s915_s9, 1024, %s923_s11, %s925_s13, %s817_s7, %s817_s7, %s818_s8  }
  0x2d   : > { %p626_p9 = scmp.ge.s32.totalorder %s814_s20, 1  ;;  %p183_p1 = scmp.lt.s32.totalorder %s814_s20, 3 }
  0x2f   : > { %p184_p3 = pnand %p626_p9, %p183_p1 }
  0x30   : > { %s949_s10 = sand.u32 (!%p184_p3), 1, %s806_s18   ;;  %p1085_p6 = scmp.ne.s32.totalorder (!%p184_p3), %s1081_s27, 0 }
  0x31   : > { %187 = sbr.rel (%p184_p3) target bundleno = 785 (0x311), region = 36  ;;  %s627_s14 = sshll.u32 (!%p184_p3), %s949_s10, 6 }
  0x32   : > { %s190_s15 = scalar_lea.sflag (!%p184_p3), [#allocation4], %s949_s10  ;;  %s193_s16 = scalar_lea.vmem (!%p184_p3), [#allocation3], %s627_s14 }
  0x36   : > { %793 = dma.done.wait (%p1085_p6), %s190_s15, 1024  }
  0x37   : > { %795 = vsyncadd (%p1085_p6), %s190_s15, 4294966272  ;;  %vm229_vm0 = vcmask 523264   ;;  %v959_v0 = vld [vmem:[%s193_s16 + $0x20] sm:$0xff]  ;;  %v963_v2 = vld [vmem:[%s193_s16 + $0x28] sm:$0xff]  ;;  %v819_v16 = vmov 0.0   ;;  %vm820_vm1 = vmmov 0   ;;  %v266_v21 = vlaneseq }
  0x38   : > { %v961_v1 = vld [vmem:[%s193_s16] sm:$0xff]  ;;  %v242_v3 = vsel %vm229_vm0, %v959_v0, 0.0  ;;  %v969_v5 = vld [vmem:[%s193_s16 + $0x8] sm:$0xff]  ;;  %v245_v6 = vsel %vm229_vm0, %v963_v2, 0.0  ;;  %v975_v8 = vld [vmem:[%s193_s16 + $0x30] sm:$0xff]  ;;  %650 = vmatprep.subr.mxu0 %v819_v16  ;;  %661 = vmatprep.subr.mxu1 %v819_v16  ;;  %vm277_vm2 = vcmask 130112  }
  0x39   : > { %v230_v4 = vsel %vm229_vm0, %v961_v1, 0.0  ;;  %243 = vadd.xlane.f32.xlu1 %v242_v3  ;;  %v233_v7 = vsel %vm229_vm0, %v969_v5, 0.0  ;;  %v977_v9 = vld [vmem:[%s193_s16 + $0x10] sm:$0xff]  ;;  %v248_v10 = vsel %vm229_vm0, %v975_v8, 0.0  ;;  %v983_v12 = vld [vmem:[%s193_s16 + $0x38] sm:$0xff]  ;;  %v255_v19 = vld [vmem:[%s1075_s2 + $0x8] sm:$0xff]  ;;  %658 = vmatprep.mubr.msk.f32.mxu0 %vm820_vm1, %v819_v16 }
  0x3a   : > { %231 = vadd.xlane.f32.xlu0 %v230_v4  ;;  %v236_v11 = vsel %vm229_vm0, %v977_v9, 0.0  ;;  %v985_v13 = vld [vmem:[%s193_s16 + $0x18] sm:$0xff]  ;;  %v251_v14 = vsel %vm229_vm0, %v983_v12, 0.0  ;;  %v256_v18 = vld [vmem:[%s1075_s2 + $0x10] sm:$0xff]  ;;  %v254_v20 = vld [vmem:[%s1075_s2] sm:$0xff]  ;;  %663 = vmatprep.mubr.msk.f32.mxu1 %vm820_vm1, %v819_v16  ;;  %v267_v22 = vand.u32 127, %v266_v21 }
  0x3b   : > { %v239_v15 = vsel %vm229_vm0, %v985_v13, 0.0  ;;  %v257_v17 = vld [vmem:[%s1075_s2 + $0x18] sm:$0xff]  ;;  %v269_v27 = vshrl.u32 %v266_v21, 7  ;;  %vm284_vm3 = vcmask 195712   ;;  %vm291_vm4 = vcmask 261312   ;;  %s220_s5 = sld [smem:[#allocation2]] }
  0x3c   : > { %651 = vmatpush3.msra.mxu0 %v257_v17  ;;  %v272_v25 = vadd.s32 4294967288, %v267_v22  ;;  %v279_v26 = vadd.s32 4294967280, %v267_v22  ;;  %v286_v31 = vadd.s32 4294967272, %v267_v22  ;;  %vm312_vm5 = vcmask 1041409   ;;  %v392_v54 = vld [vmem:[%s1076_s3] sm:$0x3] }
  0x3d   : > { %246 = vadd.xlane.f32.xlu1 %v245_v6  ;;  %652 = vmatprep.subr.mxu0 %v819_v16  ;;  %v270_v33 = vsub.s32 %v267_v22, %v269_v27  ;;  %vm314_vm6 = vcmask 261120   ;;  %vm397_vm7 = vcmask 1041408   ;;  %vm393_vm8 = vcmask 15360   ;;  %s217_s6 = scalar_lea.vmem [#allocation6], %s627_s14  ;;  %s642_s7 = sshll.u32 %s873_s0, 10 }
  0x3e   : > { %234 = vadd.xlane.f32.xlu0 %v233_v7  ;;  %653 = vmatpush3.msra.mxu0 %v256_v18  ;;  %v275_v30 = vsub.s32 %v272_v25, %v269_v27  ;;  %v282_v32 = vsub.s32 %v279_v26, %v269_v27  ;;  %v289_v38 = vsub.s32 %v286_v31, %v269_v27  ;;  %v479_v7 = vsub.s32 0, %v269_v27  ;;  %s546_s8 = sshll.u32 %s217_s6, 4  ;;  %s1026_s16 = scalar_lea.hbm %s1077_s4, %s642_s7  ;;  %s1028_s8 = int_to_ptr.vmem [resolvable:$true] %s546_s8 }
  0x3f   : > { %654 = vmatprep.subr.mxu0 %v819_v16  ;;  %662 = vmatpush3.msk.msra.mxu1 %vm397_vm7, %v392_v54  ;;  %s532_s27 = scalar_lea.sflag [#allocation5], %s949_s10  ;;  %s750_s0 = scalar_lea.vmem %s1028_s8, 1024 }
  0x40   : > { %655 = vmatpush3.msra.mxu0 %v255_v19  ;;  %p751_p11 = scmp.ne.s32.totalorder %s1028_s8, %s750_s0  ;;  %p1086_p12 = scmp.ne.s32.totalorder %s1082_s28, 0 }
  0x41   : > { %249 = vadd.xlane.f32.xlu1 %v248_v10  ;;  %656 = vmatprep.subr.mxu0 %v819_v16  ;;  %v389_v56 = vstv %s220_s5  ;;  %s821_s9 = smov [#allocation6]  }
  0x42   : > { %237 = vadd.xlane.f32.xlu0 %v236_v11  ;;  %657 = vmatpush3.msra.mxu0 %v254_v20  ;;  %p752_p13 = pnand %p751_p11, %p1086_p12  ;;  %s754_s11 = sshll.u32 %s821_s9, 4  ;;  %s755_s11 = int_to_ptr.vmem [resolvable:$false] %s754_s11 }
  0x43   : > { %s756_s12 = scalar_lea.vmem %s755_s11, 2048  ;;  %p757_p5 = scmp.lt.s32.totalorder %s1028_s8, %s755_s11 }
  0x44   : > { %p753_p4 = pneg %p752_p13  ;;  %p758_p7 = scmp.lt.s32.totalorder %s756_s12, %s750_s0 }
  0x45   : > { %252 = vadd.xlane.f32.xlu1 %v251_v14  ;;  %v498_v14 = vsub.s32 1, %v269_v27 }
  0x46   : > { %240 = vadd.xlane.f32.xlu0 %v239_v15  ;;  %p759_p8 = por %p758_p7, %p757_p5 }
  0x48   : > { %p760_p10 = pnand %p759_p8, %p753_p4 }
  0xc2   : > { %v244_v23 = vpop.xlane.xlu1 %243 }
  0xc3   : > { %v232_v24 = vpop.xlane.xlu0 %231  ;;  %v296_v41 = vrot.slane %v244_v23, %v270_v33 }
  0xc4   : > { %v271_v42 = vrot.slane %v232_v24, %v270_v33 }
  0xc6   : > { %v247_v28 = vpop.xlane.xlu1 %246 }
  0xc7   : > { %v235_v29 = vpop.xlane.xlu0 %234  ;;  %v300_v36 = vrot.slane %v247_v28, %v275_v30 }
  0xc8   : > { %v276_v37 = vrot.slane %v235_v29, %v275_v30 }
  0xc9   : > { %v301_v45 = vsel %vm277_vm2, %v300_v36, %v296_v41 }
  0xca   : > { %v250_v34 = vpop.xlane.xlu1 %249  ;;  %v278_v46 = vsel %vm277_vm2, %v276_v37, %v271_v42 }
  0xcb   : > { %v238_v35 = vpop.xlane.xlu0 %237  ;;  %v305_v39 = vrot.slane %v250_v34, %v282_v32 }
  0xcc   : > { %v283_v40 = vrot.slane %v238_v35, %v282_v32 }
  0xcd   : > { %v306_v49 = vsel %vm284_vm3, %v305_v39, %v301_v45 }
  0xce   : > { %v253_v43 = vpop.xlane.xlu1 %252  ;;  %v285_v50 = vsel %vm284_vm3, %v283_v40, %v278_v46 }
  0xcf   : > { %v241_v44 = vpop.xlane.xlu0 %240  ;;  %v310_v47 = vrot.slane %v253_v43, %v289_v38 }
  0xd0   : > { %v290_v48 = vrot.slane %v241_v44, %v289_v38 }
  0xd1   : > { %v311_v51 = vsel %vm291_vm4, %v310_v47, %v306_v49 }
  0xd2   : > { %v292_v52 = vsel %vm291_vm4, %v290_v48, %v285_v50 }
  0xd3   : > { %v313_v53 = vsel %vm312_vm5, %v311_v51, %v292_v52 }
  0xd4   : > { %659 = vmatmul.mubr.msk.f32.vlgmr.msra.gmra.mxu0 %vm314_vm6, %v313_v53 }
 0x194   : > { %v383_v55 = vpop.f32.mrf.mxu0 }
 0x195   : > { %v388_v57 = vmin.f32 %v383_v55, 0.0  ;;  %v387_v59 = vmax.f32 %v383_v55, 0.0 }
 0x196   : > { %v660_v58 = vpop.f32.mrf.mxu0 }
 0x197   : > { %v390_v60 = vmul.f32 %v389_v56, %v388_v57 }
 0x199   : > { %v391_v61 = vadd.f32 %v390_v60, %v387_v59 }
 0x19b   : > { %664 = vmatmul.mubr.msk.f32.vlgmr.msra.gmra.mxu1 %vm393_vm8, %v391_v61 }
 0x25b   : > { %v467_v62 = vpop.f32.mrf.mxu1 }
 0x25c   : > { %v632_v63 = vmul.f32 -1.442695, %v467_v62 }
 0x25d   : > { %v665_v3 = vpop.f32.mrf.mxu1 }
 0x25e   : > { %718 = vpow2.f32 %v632_v63 }
 0x26b   : > { %v719_v4 = vpop.eup %718 }
 0x26c   : > { %v474_v6 = vadd.f32 1.0, %v719_v4 }
 0x26e   : > { %720 = vrcp.f32 %v474_v6 }
 0x27b   : > { %v721_v10 = vpop.eup %720 }
 0x27c   : > { %v480_v11 = vrot.slane %v721_v10, %v479_v7  ;;  %v499_v15 = vrot.slane %v721_v10, %v498_v14 }
 0x27e   : > { %486 = vbcast.lane.b32.xlu1 %v480_v11, 264  ;;  %482 = vbcast.lane.b32.xlu0 %v480_v11, 256 }
 0x282   : > { %490 = vbcast.lane.b32.xlu1 %v480_v11, 272  ;;  %501 = vbcast.lane.b32.xlu0 %v499_v15, 256 }
 0x286   : > { %494 = vbcast.lane.b32.xlu1 %v480_v11, 280  ;;  %509 = vbcast.lane.b32.xlu0 %v499_v15, 272 }
 0x28a   : > { %505 = vbcast.lane.b32.xlu1 %v499_v15, 264 }
 0x28e   : > { %513 = vbcast.lane.b32.xlu1 %v499_v15, 280 }
 0x2f0   : > { %v487_v16 = vpop.permute.xlu1 %486  ;;  %v483_v17 = vpop.permute.xlu0 %482 }
 0x2f1   : > { %v516_v18 = vmul.f32 %v487_v16, %v969_v5  ;;  %v515_v19 = vmul.f32 %v483_v17, %v961_v1 }
 0x2f3   : > { %524 = vst.msk [vmem:[%s217_s6 + $0x8] sm:$0xff] %vm229_vm0, %v516_v18  ;;  %523 = vst.msk [vmem:[%s217_s6] sm:$0xff] %vm229_vm0, %v515_v19 }
 0x2f4   : > { %v491_v20 = vpop.permute.xlu1 %490  ;;  %v502_v21 = vpop.permute.xlu0 %501 }
 0x2f5   : > { %v517_v22 = vmul.f32 %v491_v20, %v977_v9  ;;  %v519_v23 = vmul.f32 %v502_v21, %v959_v0 }
 0x2f7   : > { %525 = vst.msk [vmem:[%s217_s6 + $0x10] sm:$0xff] %vm229_vm0, %v517_v22  ;;  %527 = vst.msk [vmem:[%s217_s6 + $0x20] sm:$0xff] %vm229_vm0, %v519_v23 }
 0x2f8   : > { %v495_v5 = vpop.permute.xlu1 %494  ;;  %v510_v1 = vpop.permute.xlu0 %509 }
 0x2f9   : > { %v518_v24 = vmul.f32 %v495_v5, %v985_v13  ;;  %v521_v25 = vmul.f32 %v510_v1, %v975_v8 }
 0x2fb   : > { %526 = vst.msk [vmem:[%s217_s6 + $0x18] sm:$0xff] %vm229_vm0, %v518_v24  ;;  %529 = vst.msk [vmem:[%s217_s6 + $0x30] sm:$0xff] %vm229_vm0, %v521_v25 }
 0x2fc   : > { %v506_v26 = vpop.permute.xlu1 %505 }
 0x2fd   : > { %v520_v9 = vmul.f32 %v506_v26, %v963_v2 }
 0x2ff   : > { %528 = vst.msk [vmem:[%s217_s6 + $0x28] sm:$0xff] %vm229_vm0, %v520_v9 }
 0x300   : > { %v514_v0 = vpop.permute.xlu1 %513 }
 0x301   : > { %v522_v8 = vmul.f32 %v514_v0, %v983_v12 }
 0x303   : > { %530 = vst.msk [vmem:[%s217_s6 + $0x38] sm:$0xff] %vm229_vm0, %v522_v8 }
 0x304   : > { %763 = shalt.err (!%p760_p10)
}
 0x305   : > { %s764_s13 = scalar_lea.hbm %s1026_s16, 1024  ;;  %s768_s24 = scalar_lea.hbm %s1077_s4, 2048 }
 0x306   : > { %p765_p0 = scmp.ne.s32.totalorder %s1026_s16, %s764_s13  ;;  %p769_p1 = scmp.lt.s32.totalorder %s1026_s16, %s1077_s4 }
 0x307   : > { %p770_p3 = scmp.lt.s32.totalorder %s768_s24, %s764_s13 }
 0x308   : > { %p766_p2 = pnand %p765_p0, %p1086_p12 }
 0x309   : > { %p771_p6 = por %p770_p3, %p769_p1 }
 0x30a   : > { %p767_p9 = pneg %p766_p2 }
 0x30c   : > { %p772_p11 = pnand %p771_p6, %p767_p9 }
 0x30e   : > { %775 = shalt.err (!%p772_p11)
}
 0x30f   : > { %s822_s5 = smov 128   ;;  %s823_s6 = smov 8  }
 0x310   : > { %668 = dma.vmem_to_hbm [thread:$0]  (%p1086_p12), %s1028_s8, 1024, %s1026_s16, %s532_s27, %s822_s5, %s822_s5, %s823_s6  }
 0x311 PF: > { %s561_s7 = sand.u32 1, %s802_s17   ;;  %p1087_p13 = scmp.ne.s32.totalorder %s1083_s29, 0 }
 0x312   : > { %p1088_p4 = scmp.ge.s32.totalorder %s814_s20, 2  ;;  %s562_s14 = scalar_lea.sflag [#allocation5], %s561_s7 }
 0x314   : > { %p675_p5 = pnand %p1088_p4, %p1087_p13 }
 0x316   : > { %p676_p7 = pneg %p675_p5 }
 0x318   : > { %797 = dma.done.wait (%p676_p7), %s562_s14, 1024  }
 0x319   : > { %799 = vsyncadd (%p676_p7), %s562_s14, 4294966272  ;;  %p18_p8 = scmp.ge.s32.totalorder %s877_s22, 4   ;;  %s1089_s17 = smov %s806_s18 }
 0x31a   : > { %s1090_s18 = smov %s810_s19  ;;  %s1091_s19 = smov %s889_s25 }
 0x31b   : > { %s1092_s20 = smov %s877_s22  ;;  %20 = sbr.rel (!%p18_p8) target bundleno = 7 (0x7), region = 81 }
 0x320   :  { %567 = vsyncpa [#allocation4], 1 }
 0x321   :  { %569 = vsyncpa [#allocation4 + $0x1], 1 }
 0x322   :  { %570 = vsyncpa [#allocation5], 1 }
 0x323   :  { %572 = vsyncpa [#allocation5 + $0x1], 1 }

</bundles_post_ra>
